<compile_context>
chip_gen: v5e
topology: v5e:2x2
jax: 0.10.0
libtpu: 0.0.40
codegen_flags: <defaults>
</compile_context>

<pallas_src>
import jax
import jax.numpy as jnp
from jax.experimental import pallas as pl
from jax.experimental.pallas import tpu as pltpu


def ann_kernel(x_ref, e_ref, h_ref, ge_ref, const_ref, out_ref):
    x = x_ref[...]                                   # (B, P, D)
    e = e_ref[...]                                   # (B, D)

    # W-path (fc_x1∘fc_x2∘fc1∘fc2) + vars-path (fc2), folded into one (P, D)
    # weight: pure VPU multiply + reduce, no MXU, no (M, M) intermediates.
    x_term = jnp.sum(jnp.sum(x * h_ref[...], axis=2), axis=1)   # (B,)

    # fc_e1∘fc1∘fc2 folded to a (1, D) row: a 10-wide dot per batch.
    e_term = jnp.sum(e * ge_ref[...], axis=1)                   # (B,)

    # Lane-dense (1, B) output; all bias terms live in the single SMEM scalar.
    out_ref[0, :] = x_term + e_term + const_ref[0]


def ann_forward(x, e, params):
    B, P, D = x.shape
    M = P * (D - 2)
    wx1, bx1, wx2, bx2, we1, be1, w1, b1, w2, b2 = params

    # --- parameter folding (tiny one-off XLA glue, no per-activation compute) ---
    w1m = w1[0, :M]                                   # (M,)  fc1 weights on CC
    w1l = w1[0, M]                                    # scalar fc1 weight on C0
    w2a_pad = jnp.pad(w2[0, :M].reshape(P, D - 2),
                      ((0, 0), (2, 0)))               # (P, D) zeros under x[:, :, :2]
    w2b = w2[0, M:]                                   # (M,)  fc2 weights on W
    wcomb = jnp.outer(w2b, w1m)                       # (M, M) fc1∘fc2 fold on CC
    g_mat = wx2.T @ wcomb                             # (P, M) fc_x2 fold
    h_mat = g_mat @ wx1                               # (P, D) fc_x1 fold
    h_full = h_mat + w2a_pad                          # (P, D) W-path + vars-path
    g_e = (w1l * (w2b @ we1)).reshape(1, D)           # (1, D) fc_e1 fold
    const = (b2[0]
             + b1[0] * jnp.sum(w2b)                   # fc1 bias through fc2
             + w1l * jnp.dot(w2b, be1)                # fc_e1 bias through fc1/fc2
             + jnp.dot(bx2, jnp.sum(wcomb, axis=1))   # fc_x2 bias through fc1/fc2
             + jnp.dot(bx1, jnp.sum(g_mat, axis=0)))  # fc_x1 bias through the fold
    const_arr = jnp.reshape(const, (1,)).astype(jnp.float32)

    # Single grid step: B=8 scalar outputs is entirely overhead-bound, so one
    # pipeline stage on all of v5e/v6e/v7x.  (For large B, tile the batch into
    # lane-dense chunks of 128 and mark the batch axis "parallel".)
    grid_spec = pltpu.PrefetchScalarGridSpec(
        num_scalar_prefetch=0,
        grid=(1,),
        in_specs=[
            pl.BlockSpec((B, P, D), lambda s: (0, 0, 0)),       # x
            pl.BlockSpec((B, D), lambda s: (0, 0)),             # e
            pl.BlockSpec((P, D), lambda s: (0, 0)),             # H_full
            pl.BlockSpec((1, D), lambda s: (0, 0)),             # g_e
            pl.BlockSpec(memory_space=pltpu.MemorySpace.SMEM),  # folded scalar const
        ],
        out_specs=pl.BlockSpec((1, B), lambda s: (0, 0)),       # lane-dense row
    )

    out = pl.pallas_call(
        ann_kernel,
        out_shape=jax.ShapeDtypeStruct((1, B), jnp.float32),
        grid_spec=grid_spec,
        compiler_params=pltpu.CompilerParams(
            dimension_semantics=("arbitrary",)),
    )(x, e, h_full, g_e, const_arr)
    return out.reshape(-1)


def ann_reference(x, e, params):
    """Pure-JAX mirror of the PyTorch forward (for verification)."""
    wx1, bx1, wx2, bx2, we1, be1, w1, b1, w2, b2 = params
    cc = x @ wx1.T + bx1                       # (B, P, M)
    cc = jnp.swapaxes(cc, 1, 2)                # (B, M, P)
    cc = cc @ wx2.T + bx2                      # (B, M, M)
    cc = jnp.swapaxes(cc, 1, 2)                # (B, M, M)
    c0 = (e @ we1.T + be1)[:, :, None]         # (B, M, 1)
    w = jnp.concatenate([cc, c0], -1)          # (B, M, M+1)
    w = w @ w1.T + b1                          # (B, M, 1)
    w = w.reshape(w.shape[0], -1)              # (B, M)
    vars_ = x[:, :, 2:].reshape(x.shape[0], -1)
    out = jnp.concatenate([vars_, w], -1)      # (B, 2M)
    return (out @ w2.T + b2).reshape(-1)


if __name__ == "__main__":
    key = jax.random.PRNGKey(0)
    B, P, D = 8, 16, 10                  # batch=8, points_dim=16, input_dim=10
    M = P * (D - 2)                      # 128
    keys = jax.random.split(key, 12)

    def lin(kw, kb, out_f, in_f):
        bound = 1.0 / jnp.sqrt(jnp.float32(in_f))
        w = jax.random.uniform(kw, (out_f, in_f), jnp.float32, -bound, bound)
        b = jax.random.uniform(kb, (out_f,), jnp.float32, -bound, bound)
        return w, b

    wx1, bx1 = lin(keys[0], keys[1], M, D)          # fc_x1
    wx2, bx2 = lin(keys[2], keys[3], M, P)          # fc_x2
    we1, be1 = lin(keys[4], keys[5], M, D)          # fc_e1
    w1, b1 = lin(keys[6], keys[7], 1, M + 1)        # fc1
    w2, b2 = lin(keys[8], keys[9], 1, 2 * M)        # fc2
    params = (wx1, bx1, wx2, bx2, we1, be1, w1, b1, w2, b2)

    x = jax.random.normal(keys[10], (B, P, D), jnp.float32)
    e = jax.random.normal(keys[11], (B, D), jnp.float32)

    out = ann_forward(x, e, params)
    jax.block_until_ready(out)

    ref = ann_reference(x, e, params)
    assert out.shape == (B,)
    assert jnp.allclose(out, ref, atol=1e-3, rtol=1e-3), (out, ref)
    print("KERNEL_OK")
</pallas_src>

<mosaic_0001>
module attributes {stable_mosaic.version = 11 : i64} {
  func.func @ann_kernel(%arg0: i32, %arg1: memref<8x16x10xf32, #tpu.memory_space<vmem>>, %arg2: memref<8x10xf32, #tpu.memory_space<vmem>>, %arg3: memref<16x10xf32, #tpu.memory_space<vmem>>, %arg4: memref<1x10xf32, #tpu.memory_space<vmem>>, %arg5: memref<1xf32, #tpu.memory_space<smem>>, %arg6: memref<1x8xf32, #tpu.memory_space<vmem>>) attributes {dimension_semantics = [#tpu.dimension_semantics<arbitrary>], iteration_bounds = array<i64: 1>, scalar_prefetch = 0 : i64, scratch_operands = 0 : i64, tpu.core_type = #tpu.core_type<tc>, window_params = [{pipeline_mode = #tpu.pipeline_mode<synchronous>, transform_indices = @transform_0, window_bounds = array<i64: 8, 16, 10>}, {pipeline_mode = #tpu.pipeline_mode<synchronous>, transform_indices = @transform_1, window_bounds = array<i64: 8, 10>}, {pipeline_mode = #tpu.pipeline_mode<synchronous>, transform_indices = @transform_2, window_bounds = array<i64: 16, 10>}, {pipeline_mode = #tpu.pipeline_mode<synchronous>, transform_indices = @transform_3, window_bounds = array<i64: 1, 10>}, {transform_indices = @transform_4, window_bounds = array<i64: 1>}, {pipeline_mode = #tpu.pipeline_mode<synchronous>, transform_indices = @transform_5, window_bounds = array<i64: 1, 8>}]} {
    %c0 = arith.constant 0 : index
    %c0_0 = arith.constant 0 : index
    %c0_1 = arith.constant 0 : index
    %0 = vector.load %arg1[%c0, %c0_0, %c0_1] : memref<8x16x10xf32, #tpu.memory_space<vmem>>, vector<8x16x10xf32>
    %c0_2 = arith.constant 0 : index
    %c0_3 = arith.constant 0 : index
    %1 = vector.load %arg2[%c0_2, %c0_3] : memref<8x10xf32, #tpu.memory_space<vmem>>, vector<8x10xf32>
    %c0_4 = arith.constant 0 : index
    %c0_5 = arith.constant 0 : index
    %2 = vector.load %arg3[%c0_4, %c0_5] : memref<16x10xf32, #tpu.memory_space<vmem>>, vector<16x10xf32>
    %3 = vector.shape_cast %2 : vector<16x10xf32> to vector<1x16x10xf32>
    %4 = vector.broadcast %3 : vector<1x16x10xf32> to vector<8x16x10xf32>
    %5 = arith.mulf %0, %4 : vector<8x16x10xf32>
    %cst = arith.constant dense<0.000000e+00> : vector<8x16xf32>
    %6 = vector.multi_reduction <add>, %5, %cst [2] : vector<8x16x10xf32> to vector<8x16xf32>
    %cst_6 = arith.constant dense<0.000000e+00> : vector<8xf32>
    %7 = vector.multi_reduction <add>, %6, %cst_6 [1] : vector<8x16xf32> to vector<8xf32>
    %c0_7 = arith.constant 0 : index
    %c0_8 = arith.constant 0 : index
    %8 = vector.load %arg4[%c0_7, %c0_8] : memref<1x10xf32, #tpu.memory_space<vmem>>, vector<1x10xf32>
    %9 = vector.broadcast %8 : vector<1x10xf32> to vector<8x10xf32>
    %10 = arith.mulf %1, %9 : vector<8x10xf32>
    %cst_9 = arith.constant dense<0.000000e+00> : vector<8xf32>
    %11 = vector.multi_reduction <add>, %10, %cst_9 [1] : vector<8x10xf32> to vector<8xf32>
    %12 = arith.addf %7, %11 : vector<8xf32>
    %c0_10 = arith.constant 0 : index
    %13 = memref.load %arg5[%c0_10] : memref<1xf32, #tpu.memory_space<smem>>
    %14 = vector.broadcast %13 : f32 to vector<8xf32>
    %15 = arith.addf %12, %14 : vector<8xf32>
    %c0_11 = arith.constant 0 : index
    %c0_12 = arith.constant 0 : index
    %16 = vector.load %arg6[%c0_11, %c0_12] : memref<1x8xf32, #tpu.memory_space<vmem>>, vector<1x8xf32>
    %17 = vector.shape_cast %16 : vector<1x8xf32> to vector<8xf32>
    %18 = vector.shape_cast %15 : vector<8xf32> to vector<1x8xf32>
    tpu.vector_store %arg6[%c0_11, %c0_12], %18 {strides = array<i32>} : memref<1x8xf32, #tpu.memory_space<vmem>>, vector<1x8xf32>,
    return
  }
  func.func @transform_0(%arg0: i32) -> (i32, i32, i32) {
    %c0_i32 = arith.constant 0 : i32
    %c0_i32_0 = arith.constant 0 : i32
    %c0_i32_1 = arith.constant 0 : i32
    %c0_i32_2 = arith.constant 0 : i32
    return %c0_i32, %c0_i32_0, %c0_i32_1 : i32, i32, i32
  }
  func.func @transform_1(%arg0: i32) -> (i32, i32) {
    %c0_i32 = arith.constant 0 : i32
    %c0_i32_0 = arith.constant 0 : i32
    %c0_i32_1 = arith.constant 0 : i32
    return %c0_i32, %c0_i32_0 : i32, i32
  }
  func.func @transform_2(%arg0: i32) -> (i32, i32) {
    %c0_i32 = arith.constant 0 : i32
    %c0_i32_0 = arith.constant 0 : i32
    %c0_i32_1 = arith.constant 0 : i32
    return %c0_i32, %c0_i32_0 : i32, i32
  }
  func.func @transform_3(%arg0: i32) -> (i32, i32) {
    %c0_i32 = arith.constant 0 : i32
    %c0_i32_0 = arith.constant 0 : i32
    %c0_i32_1 = arith.constant 0 : i32
    return %c0_i32, %c0_i32_0 : i32, i32
  }
  func.func @transform_4(%arg0: i32) -> i32 {
    %c0_i32 = arith.constant 0 : i32
    %c0_i32_0 = arith.constant 0 : i32
    return %c0_i32 : i32
  }
  func.func @transform_5(%arg0: i32) -> (i32, i32) {
    %c0_i32 = arith.constant 0 : i32
    %c0_i32_0 = arith.constant 0 : i32
    %c0_i32_1 = arith.constant 0 : i32
    return %c0_i32, %c0_i32_0 : i32, i32
  }
}

</mosaic_0001>

<bundles_post_ra>
// kernel: tpu_custom_call.1
= control target key start
LH: loop header
LB: loop body
LE: loop exit
PB: predicated region body
PF: predicated region fallthrough
CT: control target
= control target key end

     0   :  { %vm57_vm0 = vcmask 80896   ;;  %s364_s0 = inlined_call_operand.vmem [shape: f32[8,16,10], index: 0, kind: input, shape index: {}]   ;;  %s365_s1 = inlined_call_operand.vmem [shape: f32[8,10], index: 1, kind: input, shape index: {}]   ;;  %s366_s2 = inlined_call_operand.vmem [shape: f32[16,10], index: 2, kind: input, shape index: {}]   ;;  %s367_s3 = inlined_call_operand.vmem [shape: f32[1,10], index: 3, kind: input, shape index: {}]   ;;  %s368_s4 = inlined_call_operand.<no memory space> [shape: f32[1], index: 4, kind: input, shape index: {}]   ;;  %s369_s5 = inlined_call_operand.hbm [shape: f32[1,8], index: 5, kind: output, shape index: {}]  }
   0x1   :  { %v26_v0 = vld [vmem:[%s364_s0 + $0x20] sm:$0xff]  ;;  %v24_v2 = vld [vmem:[%s364_s0 + $0x10] sm:$0xff]  ;;  %v27_v7 = vld [vmem:[%s364_s0 + $0x28] sm:$0xff] }
   0x2   :  { %v39_v1 = vld [vmem:[%s366_s2] sm:$0xff]  ;;  %v40_v8 = vld [vmem:[%s366_s2 + $0x8] sm:$0xff]  ;;  %v25_v9 = vld [vmem:[%s364_s0 + $0x18] sm:$0xff] }
   0x3   :  { %v45_v3 = vmul.f32 %v39_v1, %v26_v0  ;;  %v43_v4 = vmul.f32 %v39_v1, %v24_v2  ;;  %v22_v5 = vld [vmem:[%s364_s0] sm:$0xff]  ;;  %v23_v12 = vld [vmem:[%s364_s0 + $0x8] sm:$0xff]  ;;  %v46_v14 = vmul.f32 %v40_v8, %v27_v7  ;;  %v44_v15 = vmul.f32 %v40_v8, %v25_v9 }
   0x4   :  { %v41_v6 = vmul.f32 %v39_v1, %v22_v5  ;;  %v42_v16 = vmul.f32 %v40_v8, %v23_v12 }
   0x5   :  { %v70_v10 = vsel %vm57_vm0, %v45_v3, 0.0  ;;  %v64_v11 = vsel %vm57_vm0, %v43_v4, 0.0 }
   0x6   :  { %71 = vadd.xlane.f32.xlu2 %v70_v10  ;;  %65 = vadd.xlane.f32.xlu1 %v64_v11  ;;  %v58_v13 = vsel %vm57_vm0, %v41_v6, 0.0 }
   0x7   :  { %59 = vadd.xlane.f32.xlu0 %v58_v13 }
   0x8   :  { %11 = vsyncpa [#allocation4], 0  ;;  %v73_v17 = vsel %vm57_vm0, %v46_v14, 0.0  ;;  %v67_v18 = vsel %vm57_vm0, %v44_v15, 0.0  ;;  %v61_v19 = vsel %vm57_vm0, %v42_v16, 0.0  ;;  %v29_v20 = vld [vmem:[%s364_s0 + $0x38] sm:$0xff]  ;;  %v122_v62 = vlaneseq }
   0x9   :  { %v30_v21 = vld [vmem:[%s364_s0 + $0x40] sm:$0xff]  ;;  %v28_v22 = vld [vmem:[%s364_s0 + $0x30] sm:$0xff]  ;;  %v48_v23 = vmul.f32 %v40_v8, %v29_v20  ;;  %v33_v30 = vld [vmem:[%s364_s0 + $0x58] sm:$0xff]  ;;  %vm127_vm1 = vcmask 130112   ;;  %vm150_vm2 = vcmask 1041409   ;;  %vm152_vm3 = vcmask 1042434  }
   0xa   :  { %v49_v24 = vmul.f32 %v39_v1, %v30_v21  ;;  %v47_v25 = vmul.f32 %v39_v1, %v28_v22  ;;  %v32_v29 = vld [vmem:[%s364_s0 + $0x50] sm:$0xff]  ;;  %v31_v31 = vld [vmem:[%s364_s0 + $0x48] sm:$0xff]  ;;  %v52_v33 = vmul.f32 %v40_v8, %v33_v30  ;;  %v34_v40 = vld [vmem:[%s364_s0 + $0x60] sm:$0xff]  ;;  %v338_v0 = vand.u32 127, %v122_v62  ;;  %s193_s9 = sshll.u32 %s369_s5, 4  ;;  %s194_s9 = int_to_ptr.hbm [resolvable:$true] %s193_s9 }
   0xb   :  { %v79_v26 = vsel %vm57_vm0, %v48_v23, 0.0  ;;  %v51_v32 = vmul.f32 %v39_v1, %v32_v29  ;;  %v50_v34 = vmul.f32 %v40_v8, %v31_v31  ;;  %v35_v38 = vld [vmem:[%s364_s0 + $0x68] sm:$0xff]  ;;  %v36_v39 = vld [vmem:[%s364_s0 + $0x70] sm:$0xff]  ;;  %v53_v43 = vmul.f32 %v39_v1, %v34_v40  ;;  %v37_v47 = vld [vmem:[%s364_s0 + $0x78] sm:$0xff] }
   0xc   :  { %v82_v27 = vsel %vm57_vm0, %v49_v24, 0.0  ;;  %v76_v28 = vsel %vm57_vm0, %v47_v25, 0.0  ;;  %v91_v36 = vsel %vm57_vm0, %v52_v33, 0.0  ;;  %v54_v41 = vmul.f32 %v40_v8, %v35_v38  ;;  %v38_v56 = vld [vmem:[%s365_s1] sm:$0xff] }
   0xd   :  { %v88_v35 = vsel %vm57_vm0, %v51_v32, 0.0  ;;  %v85_v37 = vsel %vm57_vm0, %v50_v34, 0.0  ;;  %v55_v42 = vmul.f32 %v39_v1, %v36_v39  ;;  %v94_v46 = vsel %vm57_vm0, %v53_v43, 0.0  ;;  %v203_v57 = vld [vmem:[%s367_s3] ss:$0 sm:$0xff]  ;;  %s230_s3 = smov [#allocation3]  }
   0xe   :  { %74 = vadd.xlane.f32.xlu2 %v73_v17  ;;  %68 = vadd.xlane.f32.xlu1 %v67_v18  ;;  %v97_v44 = vsel %vm57_vm0, %v54_v41, 0.0  ;;  %v56_v48 = vmul.f32 %v40_v8, %v37_v47  ;;  %v173_v58 = vmul.f32 %v203_v57, %v38_v56  ;;  %v125_v1 = vadd.s32 4294967288, %v338_v0  ;;  %s191_s7 = sshll.u32 %s230_s3, 4  ;;  %s192_s7 = int_to_ptr.vmem [resolvable:$true] %s191_s7 }
   0xf   :  { %62 = vadd.xlane.f32.xlu0 %v61_v19  ;;  %v100_v45 = vsel %vm57_vm0, %v55_v42, 0.0  ;;  %vm154_vm4 = vcmask 1043459   ;;  %vm156_vm5 = vcmask 1044484   ;;  %vm158_vm6 = vcmask 1045509  }
  0x10   :  { %v103_v49 = vsel %vm57_vm0, %v56_v48, 0.0  ;;  %v174_v59 = vsel %vm57_vm0, %v173_v58, 0.0  ;;  %vm160_vm7 = vcmask 1046534   ;;  %vm162_vm8 = vcmask 1047559  }
  0x11   :  { %vm165_vm9 = vcmask 130048   ;;  %v179_v42 = vstv %s368_s4  ;;  %vm184_vm10 = vcmask 57344  }
  0x16   :  { %80 = vadd.xlane.f32.xlu1 %v79_v26  ;;  %83 = vadd.xlane.f32.xlu2 %v82_v27 }
  0x17   :  { %77 = vadd.xlane.f32.xlu0 %v76_v28 }
  0x1e   :  { %89 = vadd.xlane.f32.xlu1 %v88_v35  ;;  %92 = vadd.xlane.f32.xlu2 %v91_v36 }
  0x1f   :  { %86 = vadd.xlane.f32.xlu0 %v85_v37 }
  0x26   :  { %98 = vadd.xlane.f32.xlu1 %v97_v44  ;;  %101 = vadd.xlane.f32.xlu2 %v100_v45 }
  0x27   :  { %95 = vadd.xlane.f32.xlu0 %v94_v46 }
  0x2e   :  { %175 = vadd.xlane.f32.xlu2 %v174_v59 }
  0x2f   :  { %104 = vadd.xlane.f32.xlu0 %v103_v49 }
  0x79   :  { %v72_v50 = vpop.xlane.xlu2 %71  ;;  %v66_v51 = vpop.xlane.xlu1 %65 }
  0x7a   :  { %v60_v52 = vpop.xlane.xlu0 %59  ;;  %v129_v4 = vperm.slane %v66_v51, %v338_v0  ;;  %v132_v9 = vperm.slane %v72_v50, %v338_v0 }
  0x7b   :  { %v124_v8 = vperm.slane %v60_v52, %v338_v0 }
  0x81   :  { %v69_v53 = vpop.xlane.xlu1 %68  ;;  %v75_v54 = vpop.xlane.xlu2 %74 }
  0x82   :  { %v63_v55 = vpop.xlane.xlu0 %62  ;;  %v130_v5 = vperm.slane %v69_v53, %v125_v1  ;;  %v133_v10 = vperm.slane %v75_v54, %v125_v1 }
  0x83   :  { %v126_v6 = vperm.slane %v63_v55, %v125_v1 }
  0x84   :  { %v131_v11 = vsel %vm127_vm1, %v130_v5, %v129_v4  ;;  %v134_v19 = vsel %vm127_vm1, %v133_v10, %v132_v9 }
  0x85   :  { %v128_v12 = vsel %vm127_vm1, %v126_v6, %v124_v8 }
  0x86   :  { %v151_v20 = vsel %vm150_vm2, %v131_v11, %v128_v12 }
  0x87   :  { %v153_v28 = vsel %vm152_vm3, %v134_v19, %v151_v20 }
  0x89   :  { %v81_v60 = vpop.xlane.xlu1 %80  ;;  %v84_v63 = vpop.xlane.xlu2 %83 }
  0x8a   :  { %v78_v61 = vpop.xlane.xlu0 %77  ;;  %v136_v13 = vperm.slane %v81_v60, %v125_v1  ;;  %v138_v15 = vperm.slane %v84_v63, %v338_v0 }
  0x8b   :  { %v135_v14 = vperm.slane %v78_v61, %v338_v0 }
  0x8d   :  { %v137_v21 = vsel %vm127_vm1, %v136_v13, %v135_v14 }
  0x8e   :  { %v155_v29 = vsel %vm154_vm4, %v137_v21, %v153_v28 }
  0x91   :  { %v90_v2 = vpop.xlane.xlu1 %89  ;;  %v93_v7 = vpop.xlane.xlu2 %92 }
  0x92   :  { %v87_v3 = vpop.xlane.xlu0 %86  ;;  %v141_v22 = vperm.slane %v90_v2, %v338_v0  ;;  %v142_v23 = vperm.slane %v93_v7, %v125_v1 }
  0x93   :  { %v139_v16 = vperm.slane %v87_v3, %v125_v1 }
  0x94   :  { %v143_v31 = vsel %vm127_vm1, %v142_v23, %v141_v22 }
  0x95   :  { %v140_v24 = vsel %vm127_vm1, %v139_v16, %v138_v15 }
  0x96   :  { %v157_v30 = vsel %vm156_vm5, %v140_v24, %v155_v29 }
  0x97   :  { %v159_v36 = vsel %vm158_vm6, %v143_v31, %v157_v30 }
  0x99   :  { %v99_v18 = vpop.xlane.xlu1 %98  ;;  %v102_v27 = vpop.xlane.xlu2 %101 }
  0x9a   :  { %v96_v17 = vpop.xlane.xlu0 %95  ;;  %v145_v25 = vperm.slane %v99_v18, %v125_v1  ;;  %v147_v32 = vperm.slane %v102_v27, %v338_v0 }
  0x9b   :  { %v144_v26 = vperm.slane %v96_v17, %v338_v0 }
  0x9d   :  { %v146_v33 = vsel %vm127_vm1, %v145_v25, %v144_v26 }
  0x9e   :  { %v161_v38 = vsel %vm160_vm7, %v146_v33, %v159_v36 }
  0xa1   :  { %v176_v41 = vpop.xlane.xlu2 %175 }
  0xa2   :  { %v105_v34 = vpop.xlane.xlu0 %104 }
  0xa3   :  { %v148_v35 = vperm.slane %v105_v34, %v125_v1 }
  0xa5   :  { %v149_v37 = vsel %vm127_vm1, %v148_v35, %v147_v32 }
  0xa6   :  { %v163_v39 = vsel %vm162_vm8, %v149_v37, %v161_v38 }
  0xa7   :  { %v166_v40 = vsel %vm165_vm9, %v163_v39, 0.0 }
  0xa8   :  { %167 = vadd.xlane.f32.xlu1 %v166_v40 }
 0x11b   :  { %v168_v43 = vpop.xlane.xlu1 %167 }
 0x11c   :  { %v177_v44 = vadd.f32 %v176_v41, %v168_v43 }
 0x11e   :  { %v180_v45 = vadd.f32 %v179_v42, %v177_v44 }
 0x120   :  { %v182_v46 = vperm.slane %v180_v45, %v338_v0 }
 0x122   :  { %185 = vst.msk [vmem:[#allocation3] sm:$0x1] %vm184_vm10, %v182_v46 }
 0x123   :  { %196 = dma.vmem_to_hbm [thread:$0]  %s192_s7, 16, %s194_s9, [#allocation4]  }
 0x124   :  { %228 = dma.done.wait [#allocation4], 16  }
 0x125   :  { %229 = vsyncadd [#allocation4], 4294967280 }
 0x126   :  { %201 = vsyncpa [#allocation4], 1 }

</bundles_post_ra>
